<compile_context>
chip_gen: v5e
topology: v5e:2x2
jax: 0.10.0
libtpu: 0.0.40
codegen_flags: <defaults>
</compile_context>

<pallas_src>
import math

import jax
import jax.numpy as jnp
import numpy as np
from jax import lax
from jax.experimental import pallas as pl
from jax.experimental.pallas import tpu as pltpu

NUM_STAB = 1e-6      # numerical_stabilizer from the reference implementation
ROW_TILE = 1024      # row tile for the linear layers (bf16 activations -> 1024 rows OK)
LK_TILE = 512        # key/value sequence tile (kv accumulation phase)
LQ_TILE = 512        # query sequence tile (output phase)


# ----------------------------- small helpers -----------------------------

def _vmem_limit_bytes():
    """Generation-gated VMEM limit: ~5/8 of physical, capped at 64 MiB.

    v7x (64 MiB physical) -> 40 MiB; v5e/v6e (128 MiB physical) -> 64 MiB.
    """
    try:
        cap = getattr(pltpu.get_tpu_info(), "vmem_capacity_bytes", None)
    except Exception:
        cap = None
    if not cap:
        cap = 64 * 1024 * 1024
    return int(min((cap * 5) // 8, 64 * 1024 * 1024))


def _pick_seq_tile(L, pref):
    """Largest multiple-of-8 divisor of L that is <= pref (or L itself)."""
    if L <= pref:
        return L
    if L % pref == 0:
        return pref
    for t in range(pref - 8, 7, -8):
        if L % t == 0:
            return t
    return L


# ----------------------------- linear projections -----------------------------

def _linear_kernel(x_ref, w_ref, b_ref, o_ref):
    # y = x @ W^T + b ; W^T pre-transposed & pre-cast to bf16, f32 accumulation.
    x = x_ref[...].astype(jnp.bfloat16)
    y = jnp.dot(x, w_ref[...], preferred_element_type=jnp.float32) + b_ref[...]
    o_ref[...] = y.astype(o_ref.dtype)


def linear(x, w_t_bf16, b, out_dtype):
    """x: [N, din], w_t_bf16: [din, dout] bf16, b: [dout] f32 -> [N, dout] out_dtype."""
    n, din = x.shape
    dout = w_t_bf16.shape[1]
    rt = n if n <= ROW_TILE else ROW_TILE
    return pl.pallas_call(
        _linear_kernel,
        out_shape=jax.ShapeDtypeStruct((n, dout), out_dtype),
        grid_spec=pltpu.PrefetchScalarGridSpec(
            num_scalar_prefetch=0,
            grid=(pl.cdiv(n, rt),),
            in_specs=[
                pl.BlockSpec((rt, din), lambda i: (i, 0)),
                pl.BlockSpec((din, dout), lambda i: (0, 0)),   # weight resident
                pl.BlockSpec((1, dout), lambda i: (0, 0)),
            ],
            out_specs=pl.BlockSpec((rt, dout), lambda i: (i, 0)),
        ),
        compiler_params=pltpu.CompilerParams(
            dimension_semantics=("parallel",),
            vmem_limit_bytes=_vmem_limit_bytes()),
    )(x, w_t_bf16, b.reshape(1, dout))


def _linear_qkv_kernel(x_ref, wq_ref, wk_ref, wv_ref, bq_ref, bk_ref, bv_ref,
                       q_ref, k_ref, v_ref):
    # Self-attention fused path: read the activation tile ONCE, emit q/k/v separately
    # (lane-dense stores to three outputs, no fused-qkv slab to re-slice in XLA).
    x = x_ref[...].astype(jnp.bfloat16)
    for w_ref, b_ref, o_ref in ((wq_ref, bq_ref, q_ref),
                                (wk_ref, bk_ref, k_ref),
                                (wv_ref, bv_ref, v_ref)):
        y = jnp.dot(x, w_ref[...], preferred_element_type=jnp.float32) + b_ref[...]
        o_ref[...] = y.astype(o_ref.dtype)


def linear_qkv(x, wq, wk, wv, bq, bk, bv, out_dtype):
    n, din = x.shape
    dout = wq.shape[1]
    rt = n if n <= ROW_TILE else ROW_TILE
    w_spec = pl.BlockSpec((din, dout), lambda i: (0, 0))
    b_spec = pl.BlockSpec((1, dout), lambda i: (0, 0))
    o_spec = pl.BlockSpec((rt, dout), lambda i: (i, 0))
    return pl.pallas_call(
        _linear_qkv_kernel,
        out_shape=tuple(jax.ShapeDtypeStruct((n, dout), out_dtype) for _ in range(3)),
        grid_spec=pltpu.PrefetchScalarGridSpec(
            num_scalar_prefetch=0,
            grid=(pl.cdiv(n, rt),),
            in_specs=[pl.BlockSpec((rt, din), lambda i: (i, 0)),
                      w_spec, w_spec, w_spec, b_spec, b_spec, b_spec],
            out_specs=[o_spec, o_spec, o_spec],
        ),
        compiler_params=pltpu.CompilerParams(
            dimension_semantics=("parallel",),
            vmem_limit_bytes=_vmem_limit_bytes()),
    )(x, wq, wk, wv, bq.reshape(1, dout), bk.reshape(1, dout), bv.reshape(1, dout))


# ----------------------------- FAVOR+ noncausal attention -----------------------------

def _kv_accum_kernel(k_ref, v_ref, pt_ref, kv_ref, ksum_ref, m_scr):
    """Phase A: accumulate per-head kv [M, Dh] and ksum [1, M] over Lk tiles.

    Uses an online (flash-style) running max of k_dash as the softmax-kernel stabilizer,
    so no separate global key-max pass is needed (deviates from torch's global max only
    through the 1e-6 NUM_STAB term, which cancels in num/den otherwise).
    """
    dh, m = pt_ref.shape
    dim = k_ref.shape[2]
    n_heads = dim // dh
    ratio = m ** -0.5
    norm = dh ** -0.25
    pt = pt_ref[...]                                              # [Dh, M] bf16 (resident)

    @pl.when(pl.program_id(1) == 0)
    def _():
        kv_ref[...] = jnp.zeros_like(kv_ref)
        ksum_ref[...] = jnp.zeros_like(ksum_ref)
        m_scr[...] = jnp.full(m_scr.shape, -1e30, m_scr.dtype)

    for h in range(n_heads):                                      # static unroll over heads
        lo, hi = h * dh, (h + 1) * dh
        kf = k_ref[0, :, lo:hi].astype(jnp.float32) * norm        # [Lk, Dh] f32
        k_dash = jnp.dot(kf.astype(jnp.bfloat16), pt,
                         preferred_element_type=jnp.float32)      # [Lk, M]
        k_diag = 0.5 * jnp.sum(kf * kf, axis=-1, keepdims=True)   # [Lk, 1]

        bmax = jnp.max(jnp.max(k_dash, axis=-1, keepdims=True), axis=0, keepdims=True)
        m_old = m_scr[h:h + 1, :]                                 # [1, 1]
        m_new = jnp.maximum(m_old, bmax)
        alpha = jnp.exp(m_old - m_new)                            # rescale of prior blocks

        k_prime = ratio * (jnp.exp(k_dash - k_diag - m_new) + NUM_STAB)   # [Lk, M] f32
        vh = v_ref[0, :, lo:hi]                                   # [Lk, Dh] bf16
        kv_new = lax.dot_general(                                 # contract dim 0: no .T
            k_prime.astype(jnp.bfloat16), vh,
            dimension_numbers=(((0,), (0,)), ((), ())),
            preferred_element_type=jnp.float32)                   # [M, Dh]

        kv_ref[0, h] = alpha * kv_ref[0, h] + kv_new
        ksum_ref[0, h] = alpha * ksum_ref[0, h] + jnp.sum(k_prime, axis=0, keepdims=True)
        m_scr[h:h + 1, :] = m_new


def _favor_out_kernel(q_ref, kv_ref, ksum_ref, pt_ref, o_ref):
    """Phase B: per Lq tile, compute q' feature map, numerator q'@kv, denominator q'.ksum."""
    dh, m = pt_ref.shape
    dim = q_ref.shape[2]
    n_heads = dim // dh
    ratio = m ** -0.5
    norm = dh ** -0.25
    pt = pt_ref[...]                                              # [Dh, M] bf16

    # Head grouping: each store is a 128-lane multiple (unmasked vst) when possible,
    # bounding the number of per-head f32 results live at once.
    hpg = n_heads
    for g in range(1, n_heads + 1):
        if n_heads % g == 0 and (g * dh) % 128 == 0:
            hpg = g
            break

    for g0 in range(0, n_heads, hpg):
        outs = []
        for h in range(g0, g0 + hpg):
            lo, hi = h * dh, (h + 1) * dh
            qf = q_ref[0, :, lo:hi].astype(jnp.float32) * norm    # [Lq, Dh] f32
            q_dash = jnp.dot(qf.astype(jnp.bfloat16), pt,
                             preferred_element_type=jnp.float32)  # [Lq, M]
            # fold diag + per-row max into one bias before the exp (single VALU subtract)
            bias = (0.5 * jnp.sum(qf * qf, axis=-1, keepdims=True)
                    + jnp.max(q_dash, axis=-1, keepdims=True))
            q_prime = ratio * (jnp.exp(q_dash - bias) + NUM_STAB)  # [Lq, M] f32
            # numerator: f32 x f32 MXU (kv is a long-L accumulation; keep full precision)
            num = jnp.dot(q_prime, kv_ref[0, h], preferred_element_type=jnp.float32)
            # denominator on VPU/XLU: keeps the AV matmul at a clean N = Dh
            den = jnp.sum(q_prime * ksum_ref[0, h], axis=-1, keepdims=True)
            outs.append(num * pl.reciprocal(den, approx=True))
        block = outs[0] if hpg == 1 else jnp.concatenate(outs, axis=-1)
        o_ref[0, :, g0 * dh:(g0 + hpg) * dh] = block.astype(o_ref.dtype)


def favor_attention_noncausal(q, k, v, proj_t_bf16):
    """q, k, v: [B, L, H*Dh] bf16 (head-interleaved); proj_t_bf16: [Dh, M] -> [B, L, H*Dh] bf16."""
    B, L, dim = q.shape
    dh, m = proj_t_bf16.shape
    n_heads = dim // dh
    lk_t = _pick_seq_tile(L, LK_TILE)
    lq_t = _pick_seq_tile(L, LQ_TILE)
    vmem = _vmem_limit_bytes()

    # Phase A: kv / ksum accumulation (output-resident accumulators across the Lk axis).
    kv, ksum = pl.pallas_call(
        _kv_accum_kernel,
        out_shape=(jax.ShapeDtypeStruct((B, n_heads, m, dh), jnp.float32),
                   jax.ShapeDtypeStruct((B, n_heads, 1, m), jnp.float32)),
        grid_spec=pltpu.PrefetchScalarGridSpec(
            num_scalar_prefetch=0,
            grid=(B, L // lk_t),
            in_specs=[
                pl.BlockSpec((1, lk_t, dim), lambda b, l: (b, l, 0)),     # k
                pl.BlockSpec((1, lk_t, dim), lambda b, l: (b, l, 0)),     # v
                pl.BlockSpec((dh, m), lambda b, l: (0, 0)),               # projection^T
            ],
            out_specs=[
                pl.BlockSpec((1, n_heads, m, dh), lambda b, l: (b, 0, 0, 0)),
                pl.BlockSpec((1, n_heads, 1, m), lambda b, l: (b, 0, 0, 0)),
            ],
            scratch_shapes=[pltpu.VMEM((n_heads, 1), jnp.float32)],       # running key max
        ),
        compiler_params=pltpu.CompilerParams(
            dimension_semantics=("parallel", "arbitrary"),
            vmem_limit_bytes=vmem),
    )(k, v, proj_t_bf16)

    # Phase B: Lq-tiled output; both axes parallel (feeds both v7x TensorCores / pipeliner).
    return pl.pallas_call(
        _favor_out_kernel,
        out_shape=jax.ShapeDtypeStruct((B, L, dim), jnp.bfloat16),
        grid_spec=pltpu.PrefetchScalarGridSpec(
            num_scalar_prefetch=0,
            grid=(B, L // lq_t),
            in_specs=[
                pl.BlockSpec((1, lq_t, dim), lambda b, l: (b, l, 0)),           # q
                pl.BlockSpec((1, n_heads, m, dh), lambda b, l: (b, 0, 0, 0)),   # kv (resident)
                pl.BlockSpec((1, n_heads, 1, m), lambda b, l: (b, 0, 0, 0)),    # ksum (resident)
                pl.BlockSpec((dh, m), lambda b, l: (0, 0)),                     # projection^T
            ],
            out_specs=pl.BlockSpec((1, lq_t, dim), lambda b, l: (b, l, 0)),
        ),
        compiler_params=pltpu.CompilerParams(
            dimension_semantics=("parallel", "parallel"),
            vmem_limit_bytes=vmem),
    )(q, kv, ksum, proj_t_bf16)


# ----------------------------- parameter setup -----------------------------

def orthogonal_gaussian_random_feature(key, m, d):
    num_squares = m // d
    remainder = m - d * num_squares
    n_blocks = num_squares + (1 if remainder else 0)
    keys = jax.random.split(key, max(n_blocks, 1))
    blocks = []
    for i in range(num_squares):
        g = jax.random.normal(keys[i], (d, d), jnp.float32)
        qm, _ = jnp.linalg.qr(g)
        blocks.append(qm.T)
    if remainder:
        g = jax.random.normal(keys[num_squares], (d, d), jnp.float32)
        qm, _ = jnp.linalg.qr(g)
        blocks.append(qm.T[:remainder])
    matrix = jnp.concatenate(blocks, axis=0)
    return matrix / jnp.sqrt(jnp.asarray(num_squares + remainder / d, jnp.float32))


def init_params(key, dim, head_num, nb_random_features):
    d_k = dim // head_num
    ks = jax.random.split(key, 9)
    bound = 1.0 / math.sqrt(dim)

    def lin_init(kw, kb):
        w_t = jax.random.uniform(kw, (dim, dim), jnp.float32, -bound, bound)  # stored as W^T
        b = jax.random.uniform(kb, (dim,), jnp.float32, -bound, bound)
        return w_t, b

    w_q, b_q = lin_init(ks[0], ks[1])
    w_k, b_k = lin_init(ks[2], ks[3])
    w_v, b_v = lin_init(ks[4], ks[5])
    w_o, b_o = lin_init(ks[6], ks[7])
    proj = orthogonal_gaussian_random_feature(ks[8], nb_random_features, d_k)

    params = dict(head_num=head_num,
                  w_q=w_q, b_q=b_q, w_k=w_k, b_k=b_k, w_v=w_v, b_v=b_v,
                  w_o=w_o, b_o=b_o, proj=proj)
    # Kernel-side prepared weights: bf16 MXU operands, transposed projection matrix.
    params.update(
        w_q_bf16=w_q.astype(jnp.bfloat16),
        w_k_bf16=w_k.astype(jnp.bfloat16),
        w_v_bf16=w_v.astype(jnp.bfloat16),
        w_o_bf16=w_o.astype(jnp.bfloat16),
        proj_t_bf16=proj.T.astype(jnp.bfloat16),
    )
    return params


# ----------------------------- forward pass -----------------------------

def multi_head_favor_attention(params, query, key, value):
    B, L, dim = query.shape

    if (query is key) and (key is value):
        # Self-attention: read activations once, emit q/k/v as three bf16 outputs.
        q, k, v = linear_qkv(query.reshape(B * L, dim),
                             params["w_q_bf16"], params["w_k_bf16"], params["w_v_bf16"],
                             params["b_q"], params["b_k"], params["b_v"],
                             jnp.bfloat16)
    else:
        q = linear(query.reshape(B * L, dim), params["w_q_bf16"], params["b_q"], jnp.bfloat16)
        k = linear(key.reshape(B * L, dim), params["w_k_bf16"], params["b_k"], jnp.bfloat16)
        v = linear(value.reshape(B * L, dim), params["w_v_bf16"], params["b_v"], jnp.bfloat16)
    q = q.reshape(B, L, dim)
    k = k.reshape(B, L, dim)
    v = v.reshape(B, L, dim)

    attn = favor_attention_noncausal(q, k, v, params["proj_t_bf16"])      # [B, L, dim] bf16
    out = linear(attn.reshape(B * L, dim), params["w_o_bf16"], params["b_o"], jnp.float32)
    # Dropout(p=0.1): identity in eval/inference mode.
    return out.reshape(B, L, dim)


# ----------------------------- pure-JAX f32 reference -----------------------------

def reference_forward(params, query, key, value):
    B, L, dim = query.shape
    H = params["head_num"]
    d_k = dim // H
    proj = params["proj"]
    M = proj.shape[0]

    def lin(x, w_t, b):
        return x @ w_t + b

    q = lin(query, params["w_q"], params["b_q"]).reshape(B, L, H, d_k)
    k = lin(key, params["w_k"], params["b_k"]).reshape(B, L, H, d_k)
    v = lin(value, params["w_v"], params["b_v"]).reshape(B, L, H, d_k)

    def softmax_kernel(data, is_query):
        data = (data.shape[-1] ** -0.25) * data
        ratio = M ** -0.5
        data_dash = jnp.einsum("blhd,md->blhm", data, proj)
        diag = 0.5 * jnp.sum(data * data, axis=-1, keepdims=True)
        mx = jnp.max(data_dash, axis=-1, keepdims=True) if is_query else jnp.max(data_dash)
        return ratio * (jnp.exp(data_dash - diag - mx) + NUM_STAB)

    qp = softmax_kernel(q, True)
    kp = softmax_kernel(k, False)
    kvs = jnp.einsum("blhm,blhd->bhmd", kp, v)
    num = jnp.einsum("blhm,bhmd->blhd", qp, kvs)
    den = jnp.einsum("blhm,bhm->blh", qp, jnp.sum(kp, axis=1))[..., None]
    attn = (num / den).reshape(B, L, dim)
    return lin(attn, params["w_o"], params["b_o"])


# ----------------------------- main -----------------------------

if __name__ == "__main__":
    B, L, dim, H, M = 2, 8, 32, 4, 16   # d_k = 8
    root = jax.random.PRNGKey(0)
    kp, kq, kk, kvk = jax.random.split(root, 4)
    params = init_params(kp, dim, H, M)
    q_in = jax.random.normal(kq, (B, L, dim), jnp.float32)
    k_in = jax.random.normal(kk, (B, L, dim), jnp.float32)
    v_in = jax.random.normal(kvk, (B, L, dim), jnp.float32)

    # Tolerance is loosened vs. the pure-f32 reference because the kernels use bf16 MXU
    # operands AND bf16 inter-kernel activations (f32 accumulation in-kernel), an online
    # per-batch key max (vs. torch's global max; differs only via the 1e-6 stabilizer),
    # and an approximate EUP reciprocal.
    RTOL, ATOL = 8e-2, 4e-2

    # 1) cross-attention path (separate Q/K/V projections)
    out = jax.block_until_ready(multi_head_favor_attention(params, q_in, k_in, v_in))
    ref = reference_forward(params, q_in, k_in, v_in)
    np.testing.assert_allclose(np.asarray(out), np.asarray(ref), rtol=RTOL, atol=ATOL)

    # 2) self-attention path (fused QKV projection, 3-output pallas_call)
    out2 = jax.block_until_ready(multi_head_favor_attention(params, q_in, q_in, q_in))
    ref2 = reference_forward(params, q_in, q_in, q_in)
    np.testing.assert_allclose(np.asarray(out2), np.asarray(ref2), rtol=RTOL, atol=ATOL)

    print("KERNEL_OK")
</pallas_src>

<mosaic_0001>
module attributes {stable_mosaic.version = 11 : i64} {
  func.func @_linear_kernel(%arg0: i32, %arg1: memref<16x32xf32, #tpu.memory_space<vmem>>, %arg2: memref<32x32xbf16, #tpu.memory_space<vmem>>, %arg3: memref<1x32xf32, #tpu.memory_space<vmem>>, %arg4: memref<16x32xbf16, #tpu.memory_space<vmem>>) attributes {dimension_semantics = [#tpu.dimension_semantics<parallel>], iteration_bounds = array<i64: 1>, scalar_prefetch = 0 : i64, scratch_operands = 0 : i64, tpu.core_type = #tpu.core_type<tc>, window_params = [{transform_indices = @transform_0, window_bounds = array<i64: 16, 32>}, {pipeline_mode = #tpu.pipeline_mode<synchronous>, transform_indices = @transform_1, window_bounds = array<i64: 32, 32>}, {pipeline_mode = #tpu.pipeline_mode<synchronous>, transform_indices = @transform_2, window_bounds = array<i64: 1, 32>}, {transform_indices = @transform_3, window_bounds = array<i64: 16, 32>}]} {
    %c0 = arith.constant 0 : index
    %c0_0 = arith.constant 0 : index
    %0 = vector.load %arg1[%c0, %c0_0] : memref<16x32xf32, #tpu.memory_space<vmem>>, vector<16x32xf32>
    %1 = arith.truncf %0 : vector<16x32xf32> to vector<16x32xbf16>
    %c0_1 = arith.constant 0 : index
    %c0_2 = arith.constant 0 : index
    %2 = vector.load %arg2[%c0_1, %c0_2] : memref<32x32xbf16, #tpu.memory_space<vmem>>, vector<32x32xbf16>
    %cst = arith.constant dense<0.000000e+00> : vector<16x32xf32>
    %3 = tpu.matmul %1, %2, %cst {dimension_numbers = #tpu.dot_dimension_numbers<[1], [0], [0], [1], [0, 0, 1, 1], [], []>} : vector<16x32xbf16>, vector<32x32xbf16>, vector<16x32xf32> -> vector<16x32xf32>
    %c0_3 = arith.constant 0 : index
    %c0_4 = arith.constant 0 : index
    %4 = vector.load %arg3[%c0_3, %c0_4] : memref<1x32xf32, #tpu.memory_space<vmem>>, vector<1x32xf32>
    %5 = vector.broadcast %4 : vector<1x32xf32> to vector<16x32xf32>
    %6 = arith.addf %3, %5 : vector<16x32xf32>
    %7 = arith.truncf %6 : vector<16x32xf32> to vector<16x32xbf16>
    %c0_5 = arith.constant 0 : index
    %c0_6 = arith.constant 0 : index
    %8 = vector.load %arg4[%c0_5, %c0_6] : memref<16x32xbf16, #tpu.memory_space<vmem>>, vector<16x32xbf16>
    tpu.vector_store %arg4[%c0_5, %c0_6], %7 {strides = array<i32>} : memref<16x32xbf16, #tpu.memory_space<vmem>>, vector<16x32xbf16>,
    return
  }
  func.func @transform_0(%arg0: i32) -> (i32, i32) {
    %c0_i32 = arith.constant 0 : i32
    %c0_i32_0 = arith.constant 0 : i32
    return %arg0, %c0_i32 : i32, i32
  }
  func.func @transform_1(%arg0: i32) -> (i32, i32) {
    %c0_i32 = arith.constant 0 : i32
    %c0_i32_0 = arith.constant 0 : i32
    %c0_i32_1 = arith.constant 0 : i32
    return %c0_i32, %c0_i32_0 : i32, i32
  }
  func.func @transform_2(%arg0: i32) -> (i32, i32) {
    %c0_i32 = arith.constant 0 : i32
    %c0_i32_0 = arith.constant 0 : i32
    %c0_i32_1 = arith.constant 0 : i32
    return %c0_i32, %c0_i32_0 : i32, i32
  }
  func.func @transform_3(%arg0: i32) -> (i32, i32) {
    %c0_i32 = arith.constant 0 : i32
    %c0_i32_0 = arith.constant 0 : i32
    return %arg0, %c0_i32 : i32, i32
  }
}

</mosaic_0001>

<bundles_post_ra>
// kernel: tpu_custom_call.1
= control target key start
LH: loop header
LB: loop body
LE: loop exit
PB: predicated region body
PF: predicated region fallthrough
CT: control target
= control target key end

     0   :  { %8 = vsyncpa [#allocation3], 0  ;;  %s256_s0 = inlined_call_operand.hbm [shape: f32[16,32], index: 0, kind: input, shape index: {}]   ;;  %s257_s1 = inlined_call_operand.hbm [shape: bf16[32,32], index: 1, kind: input, shape index: {}]   ;;  %s258_s2 = inlined_call_operand.vmem [shape: f32[1,32], index: 2, kind: input, shape index: {}]   ;;  %s259_s3 = inlined_call_operand.hbm [shape: bf16[16,32], index: 3, kind: output, shape index: {}]  }
   0x1   :  { %9 = vsyncpa [#allocation6], 0 }
   0x2   :  { %10 = vsyncpa [#allocation4], 0  ;;  %s15_s14 = sshll.u32 %s256_s0, 4  ;;  %s211_s15 = smov [#allocation2]   ;;  %s16_s14 = int_to_ptr.hbm [resolvable:$true] %s15_s14 }
   0x3   :  { %s17_s16 = sshll.u32 %s211_s15, 4  ;;  %s28_s19 = sshll.u32 %s257_s1, 4  ;;  %s18_s16 = int_to_ptr.vmem [resolvable:$true] %s17_s16  ;;  %s29_s19 = int_to_ptr.hbm [resolvable:$true] %s28_s19 }
   0x4   :  { %s212_s20 = smov 128   ;;  %s213_s21 = smov 8  }
   0x5   :  { %23 = dma.hbm_to_vmem [thread:$0]  %s16_s14, 256, %s18_s16, [#allocation3], %s212_s20, %s212_s20, %s213_s21  }
   0x6   :  { %s214_s22 = smov [#allocation5]   ;;  %s215_s24 = smov 64  }
   0x7   :  { %s30_s23 = sshll.u32 %s214_s22, 4  ;;  %s216_s25 = smov 4   ;;  %s31_s23 = int_to_ptr.vmem [resolvable:$true] %s30_s23 }
   0x8   :  { %36 = dma.hbm_to_vmem [thread:$0]  %s29_s19, 256, %s31_s23, [#allocation6], %s215_s24, %s215_s24, %s216_s25  }
   0x9   :  { %205 = dma.done.wait [#allocation3], 256  }
   0xa   :  { %206 = vsyncadd [#allocation3], 4294967040 }
   0xb   :  { %207 = dma.done.wait [#allocation6], 256  }
   0xc   :  { %208 = vsyncadd [#allocation6], 4294967040  ;;  %v124_v0 = vld [vmem:[#allocation5 + $0x8] sm:$0xff]  ;;  %v123_v1 = vld [vmem:[#allocation5] sm:$0xff]  ;;  %vm71_vm0 = vcmask 261120   ;;  %vm91_vm1 = vcmask 257024  }
   0xd   :  { %81 = vmatpush.bf16.msra.mxu0 %v124_v0  ;;  %v48_v2 = vld [vmem:[#allocation2] sm:$0xff]  ;;  %v49_v3 = vld [vmem:[#allocation2 + $0x8] sm:$0xff]  ;;  %s217_s26 = smov [#allocation7]   ;;  %s100_s30 = sshll.u32 %s259_s3, 4  ;;  %s101_s30 = int_to_ptr.hbm [resolvable:$true] %s100_s30 }
   0xe   :  { %v50_v4 = vpack.c.bf16 %v49_v3, %v48_v2  ;;  %v132_v5 = vld [vmem:[%s258_s2] ss:$0 sm:$0xff]  ;;  %s98_s27 = sshll.u32 %s217_s26, 4  ;;  %s99_s27 = int_to_ptr.vmem [resolvable:$true] %s98_s27 }
  0x11   :  { %82 = vmatpush.bf16.msra.mxu0 %v123_v1 }
  0x14   :  { %122 = vmatmul.msk.bf16.vlgmr.msra.gmra.mxu0 %vm71_vm0, %v50_v4 }
  0x91   :  { %v84_v6 = vpop.f32.mrf.mxu0 }
  0x92   :  { %v85_v7 = vadd.f32 %v132_v5, %v84_v6 }
  0x94   :  { %v89_v8 = vpack.c.bf16 %v85_v7, %v85_v7 }
  0x96   :  { %92 = vst.msk [vmem:[#allocation7] sm:$0xf] %vm91_vm1, %v89_v8 }
  0x99   :  { %v86_v9 = vpop.f32.mrf.mxu0 }
  0x9a   :  { %v87_v10 = vadd.f32 %v132_v5, %v86_v9 }
  0x9c   :  { %v90_v11 = vpack.c.bf16 %v87_v10, %v87_v10 }
  0x9e   :  { %93 = vst.msk [vmem:[#allocation7 + $0x4] sm:$0xf] %vm91_vm1, %v90_v11 }
  0x9f   :  { %106 = dma.vmem_to_hbm [thread:$0]  %s99_s27, 128, %s101_s30, [#allocation4], %s215_s24, %s215_s24, %s216_s25  }
  0xa0   :  { %209 = dma.done.wait [#allocation4], 128  }
  0xa1   :  { %210 = vsyncadd [#allocation4], 4294967168 }
  0xa2   :  { %111 = vsyncpa [#allocation3], 1 }
  0xa3   :  { %112 = vsyncpa [#allocation6], 1 }
  0xa4   :  { %113 = vsyncpa [#allocation4], 1 }

</bundles_post_ra>
